<compile_context>
chip_gen: v7x
topology: tpu7x:2x2x1
jax: 0.10.0
libtpu: 0.0.40
codegen_flags: <defaults>
</compile_context>

<pallas_src>
import jax
import jax.numpy as jnp
from jax.experimental import pallas as pl
from jax.experimental.pallas import tpu as pltpu


# ----------------------------------------------------------------------------
# Pallas kernel: one (output-channel tile, batch element) grid step.
# ----------------------------------------------------------------------------
def _spectral_conv2d_kernel(xr_ref, xc_ref, ax_ref, ay_ref, o_ref):
    """xr_ref: (1, I*M, N)   x in row layout,  row  i*M + m == x[b, i, m, :]
       xc_ref: (1, M, I*N)   x in col layout,  col  i*N + n == x[b, i, :, n]
       ax_ref: (TO*M, I*M)   x-axis operator tile, [(o, m_out), (i, m_in)]
       ay_ref: (I*N, TO*N)   y-axis operator tile, [(i, n_in), (o, n_out)]
       o_ref:  (1, M, TO*N)  lane-dense output slab, col o*N + n
    """
    M = xc_ref.shape[1]
    N = xr_ref.shape[2]
    TO = o_ref.shape[2] // N

    # x-branch: ONE fat MXU matmul, contraction depth K = I*M (MXU accumulates).
    xx = jnp.dot(ax_ref[...], xr_ref[0],
                 preferred_element_type=jnp.float32)            # (TO*M, N) f32
    # y-branch: ONE fat MXU matmul, contraction depth K = I*N, lane-dense out.
    xy = jnp.dot(xc_ref[0], ay_ref[...],
                 preferred_element_type=jnp.float32)            # (M, TO*N) f32

    # Re-lay the x-branch result as an (M, TO*N) slab (static sublane slices at
    # multiples of M + lane concat) so the combined store is one dense write.
    if TO > 1:
        xx_w = jnp.concatenate(
            [xx[o * M:(o + 1) * M, :] for o in range(TO)], axis=1)
    else:
        xx_w = xx
    o_ref[0] = (xx_w + xy).astype(o_ref.dtype)


# ----------------------------------------------------------------------------
# Parameter-only precompute (done once per model, outside the hot path).
# ----------------------------------------------------------------------------
def _axis_operator(w_complex, length, mode):
    """Exact real (I, O, L_out, L_in) operator for one axis:
       rfft(ortho) -> keep first k modes -> complex channel mix (or identity
       for 'low-pass') -> zero-pad spectrum -> irfft(n=length, ortho)."""
    I, O, k = w_complex.shape
    eye_l = jnp.eye(length, dtype=jnp.float32)
    F = jnp.fft.rfft(eye_l, axis=0, norm="ortho")[:k]            # (k, L) complex
    E = jnp.eye(k, length // 2 + 1, dtype=jnp.complex64)
    Br = jnp.fft.irfft(E, n=length, axis=1, norm="ortho").T      # (L, k) real-part basis
    Bi = jnp.fft.irfft(1j * E, n=length, axis=1, norm="ortho").T  # (L, k) imag-part basis
    if mode == "low-pass":
        w_complex = jnp.broadcast_to(
            jnp.eye(I, O, dtype=jnp.complex64)[:, :, None], (I, O, k))
    Yop = w_complex[:, :, :, None] * F[None, None, :, :]         # (I, O, k, L)
    A = (jnp.einsum("mk,iokn->iomn", Br, jnp.real(Yop)) +
         jnp.einsum("mk,iokn->iomn", Bi, jnp.imag(Yop)))         # (I, O, L_out, L_in)
    return A


def precompute_spectral_operators(w0, w1, M, N, mode="full",
                                  operator_dtype=jnp.bfloat16):
    """w0: (I, O, modes_x, 2), w1: (I, O, modes_y, 2) — torch fourier_weight layout.
       Returns bf16 folded operators:
         ax_mat: (O*M, I*M)  with [(o, m_out), (i, m_in)] layout  (x-branch LHS)
         ay_mat: (I*N, O*N)  with [(i, n_in), (o, n_out)] layout  (y-branch RHS)
    """
    I, O = w0.shape[0], w0.shape[1]
    if mode == "low-pass":
        assert I == O, "low-pass mode assumes in_dim == out_dim"
    w0c = (w0[..., 0] + 1j * w0[..., 1]).astype(jnp.complex64)
    w1c = (w1[..., 0] + 1j * w1[..., 1]).astype(jnp.complex64)
    Ax = _axis_operator(w0c, M, mode)                            # (I, O, M, M)
    Ay = _axis_operator(w1c, N, mode)                            # (I, O, N, N)
    ax_mat = jnp.transpose(Ax, (1, 2, 0, 3)).reshape(O * M, I * M)
    ay_mat = jnp.transpose(Ay, (0, 3, 1, 2)).reshape(I * N, O * N)
    return ax_mat.astype(operator_dtype), ay_mat.astype(operator_dtype)


# ----------------------------------------------------------------------------
# VMEM-aware tiling helpers.
# ----------------------------------------------------------------------------
def _vmem_limit_bytes():
    try:
        cap = int(pltpu.get_tpu_info().vmem_capacity_bytes)
    except Exception:
        cap = 128 * 1024 * 1024
    # Leave double-buffer / compiler headroom; cap the request on big-VMEM chips.
    return min(cap * 3 // 4, 100 * 1024 * 1024)


def _pick_o_tile(I, O, M, N, itemsize, vmem_budget):
    """Largest output-channel tile whose per-step blocks fit the VMEM budget and
    satisfy the BlockSpec (sublane, lane) alignment rules."""
    def valid(t):
        return t == O or ((t * N) % 128 == 0 and (t * M) % 16 == 0)

    def footprint(t):
        op = (t * M * I * M + I * N * t * N) * itemsize     # operator tiles
        xb = (I * M * N + M * I * N) * itemsize             # both x layouts
        ob = M * t * N * 4                                  # f32 output slab
        return 2 * (op + xb + ob)                           # double buffering

    cands = [t for t in range(1, O + 1) if O % t == 0 and valid(t)]
    fits = [t for t in cands if footprint(t) <= vmem_budget]
    return max(fits) if fits else min(cands)


# ----------------------------------------------------------------------------
# Wrapper: single fused pallas_call, NCHW in -> NCHW out.
# ----------------------------------------------------------------------------
def spectral_conv2d_forward(x, ax_mat, ay_mat, *, o_tile=None):
    B, I, M, N = x.shape
    O = ay_mat.shape[1] // N
    assert ax_mat.shape == (O * M, I * M), ax_mat.shape
    assert ay_mat.shape == (I * N, O * N), ay_mat.shape

    cdtype = ax_mat.dtype
    vmem_limit = _vmem_limit_bytes()
    if o_tile is None:
        o_tile = _pick_o_tile(I, O, M, N, jnp.dtype(cdtype).itemsize,
                              int(vmem_limit * 0.7))
    assert O % o_tile == 0
    n_ot = O // o_tile

    # Two layouts of the same input (row contraction for x-branch, column
    # contraction for y-branch), cast to the operator compute dtype (bf16).
    x_rows = x.reshape(B, I * M, N).astype(cdtype)                           # (B, I*M, N)
    x_cols = jnp.transpose(x, (0, 2, 1, 3)).reshape(B, M, I * N).astype(cdtype)  # (B, M, I*N)

    out_wide = pl.pallas_call(
        _spectral_conv2d_kernel,
        out_shape=jax.ShapeDtypeStruct((B, M, O * N), jnp.float32),
        grid=(n_ot, B),   # operator tile outer (stays resident across batch), batch inner
        in_specs=[
            pl.BlockSpec((1, I * M, N), lambda ot, b: (b, 0, 0)),
            pl.BlockSpec((1, M, I * N), lambda ot, b: (b, 0, 0)),
            pl.BlockSpec((o_tile * M, I * M), lambda ot, b: (ot, 0)),
            pl.BlockSpec((I * N, o_tile * N), lambda ot, b: (0, ot)),
        ],
        out_specs=pl.BlockSpec((1, M, o_tile * N), lambda ot, b: (b, 0, ot)),
        compiler_params=pltpu.CompilerParams(
            dimension_semantics=("parallel", "parallel"),
            vmem_limit_bytes=int(vmem_limit)),
    )(x_rows, x_cols, ax_mat, ay_mat)

    # Layout plumbing back to NCHW (cheap XLA transpose over output bytes only).
    return jnp.transpose(out_wide.reshape(B, M, O, N), (0, 2, 1, 3))


# ----------------------------------------------------------------------------
# Pure-JAX reference (mirrors the torch forward with jnp.fft) for a sanity check.
# ----------------------------------------------------------------------------
def spectral_conv2d_reference(x, w0, w1, mode="full"):
    B, I, M, N = x.shape
    kx, ky = w0.shape[2], w1.shape[2]
    w0c = w0[..., 0] + 1j * w0[..., 1]
    w1c = w1[..., 0] + 1j * w1[..., 1]

    x_ftx = jnp.fft.rfft(x, axis=-2, norm="ortho")                   # (B, I, M//2+1, N)
    out_ft = jnp.zeros((B, w0.shape[1], M // 2 + 1, N), jnp.complex64)
    mix = (jnp.einsum("bixy,iox->boxy", x_ftx[:, :, :kx, :], w0c)
           if mode == "full" else x_ftx[:, :, :kx, :])
    out_ft = out_ft.at[:, :, :kx, :].set(mix)
    xx = jnp.fft.irfft(out_ft, n=M, axis=-2, norm="ortho")

    x_fty = jnp.fft.rfft(x, axis=-1, norm="ortho")                   # (B, I, M, N//2+1)
    out_ft2 = jnp.zeros((B, w1.shape[1], M, N // 2 + 1), jnp.complex64)
    mix2 = (jnp.einsum("bixy,ioy->boxy", x_fty[:, :, :, :ky], w1c)
            if mode == "full" else x_fty[:, :, :, :ky])
    out_ft2 = out_ft2.at[:, :, :, :ky].set(mix2)
    xy = jnp.fft.irfft(out_ft2, n=N, axis=-1, norm="ortho")
    return xx + xy


if __name__ == "__main__":
    key = jax.random.PRNGKey(0)
    k_x, k_w0, k_w1 = jax.random.split(key, 3)

    # Small shapes consistent with the module (torch version needs in_dim == out_dim).
    B, C, M, N = 2, 4, 16, 16
    modes_x, modes_y = 8, 8            # <= M//2+1, N//2+1
    mode = "full"

    x = jax.random.normal(k_x, (B, C, M, N), jnp.float32)
    # xavier_normal_-like std for the (I, O, modes, 2) fourier weights
    std_x = (1.0 / ((C + C) * modes_x)) ** 0.5
    std_y = (1.0 / ((C + C) * modes_y)) ** 0.5
    w0 = std_x * jax.random.normal(k_w0, (C, C, modes_x, 2), jnp.float32)
    w1 = std_y * jax.random.normal(k_w1, (C, C, modes_y, 2), jnp.float32)

    # One-time, parameter-only fold of (rfft -> mode mix -> irfft) into bf16 matrices.
    ax_mat, ay_mat = precompute_spectral_operators(w0, w1, M, N, mode=mode)

    fwd = jax.jit(spectral_conv2d_forward)
    out = jax.block_until_ready(fwd(x, ax_mat, ay_mat))

    assert out.shape == (B, C, M, N), out.shape
    assert bool(jnp.all(jnp.isfinite(out)))

    # Sanity check against the jnp.fft reference of the torch forward.
    # bf16 operands (f32 accumulation) -> slightly relaxed tolerance vs pure f32.
    ref = spectral_conv2d_reference(x, w0, w1, mode=mode)
    err = float(jnp.max(jnp.abs(out - ref)))
    tol = 5e-2 * (1.0 + float(jnp.max(jnp.abs(ref))))
    assert err < tol, f"max abs err {err} vs tol {tol}"

    print("KERNEL_OK")
</pallas_src>

<mosaic_0001>
module attributes {stable_mosaic.version = 11 : i64} {
  func.func @_spectral_conv2d_kernel(%arg0: i32, %arg1: i32, %arg2: memref<1x64x16xbf16, #tpu.memory_space<vmem>>, %arg3: memref<1x16x64xbf16, #tpu.memory_space<vmem>>, %arg4: memref<64x64xbf16, #tpu.memory_space<vmem>>, %arg5: memref<64x64xbf16, #tpu.memory_space<vmem>>, %arg6: memref<1x16x64xf32, #tpu.memory_space<vmem>>) attributes {dimension_semantics = [#tpu.dimension_semantics<parallel>, #tpu.dimension_semantics<parallel>], iteration_bounds = array<i64: 1, 2>, scalar_prefetch = 0 : i64, scratch_operands = 0 : i64, tpu.core_type = #tpu.core_type<tc>, window_params = [{transform_indices = @transform_0, window_bounds = array<i64: 1, 64, 16>}, {transform_indices = @transform_1, window_bounds = array<i64: 1, 16, 64>}, {transform_indices = @transform_2, window_bounds = array<i64: 64, 64>}, {transform_indices = @transform_3, window_bounds = array<i64: 64, 64>}, {transform_indices = @transform_4, window_bounds = array<i64: 1, 16, 64>}]} {
    %c0 = arith.constant 0 : index
    %c0_0 = arith.constant 0 : index
    %0 = vector.load %arg4[%c0, %c0_0] : memref<64x64xbf16, #tpu.memory_space<vmem>>, vector<64x64xbf16>
    %c0_1 = arith.constant 0 : index
    %c0_2 = arith.constant 0 : index
    %c0_3 = arith.constant 0 : index
    %1 = vector.load %arg2[%c0_1, %c0_2, %c0_3] : memref<1x64x16xbf16, #tpu.memory_space<vmem>>, vector<1x64x16xbf16>
    %2 = vector.shape_cast %1 : vector<1x64x16xbf16> to vector<64x16xbf16>
    %cst = arith.constant dense<0.000000e+00> : vector<64x16xf32>
    %3 = tpu.matmul %0, %2, %cst {dimension_numbers = #tpu.dot_dimension_numbers<[1], [0], [0], [1], [0, 0, 1, 1], [], []>} : vector<64x64xbf16>, vector<64x16xbf16>, vector<64x16xf32> -> vector<64x16xf32>
    %c0_4 = arith.constant 0 : index
    %c0_5 = arith.constant 0 : index
    %c0_6 = arith.constant 0 : index
    %4 = vector.load %arg3[%c0_4, %c0_5, %c0_6] : memref<1x16x64xbf16, #tpu.memory_space<vmem>>, vector<1x16x64xbf16>
    %5 = vector.shape_cast %4 : vector<1x16x64xbf16> to vector<16x64xbf16>
    %c0_7 = arith.constant 0 : index
    %c0_8 = arith.constant 0 : index
    %6 = vector.load %arg5[%c0_7, %c0_8] : memref<64x64xbf16, #tpu.memory_space<vmem>>, vector<64x64xbf16>
    %cst_9 = arith.constant dense<0.000000e+00> : vector<16x64xf32>
    %7 = tpu.matmul %5, %6, %cst_9 {dimension_numbers = #tpu.dot_dimension_numbers<[1], [0], [0], [1], [0, 0, 1, 1], [], []>} : vector<16x64xbf16>, vector<64x64xbf16>, vector<16x64xf32> -> vector<16x64xf32>
    %8 = vector.extract_strided_slice %3 {offsets = [0, 0], sizes = [16, 16], strides = [1, 1]} : vector<64x16xf32> to vector<16x16xf32>
    %9 = vector.extract_strided_slice %3 {offsets = [16, 0], sizes = [16, 16], strides = [1, 1]} : vector<64x16xf32> to vector<16x16xf32>
    %10 = vector.extract_strided_slice %3 {offsets = [32, 0], sizes = [16, 16], strides = [1, 1]} : vector<64x16xf32> to vector<16x16xf32>
    %11 = vector.extract_strided_slice %3 {offsets = [48, 0], sizes = [16, 16], strides = [1, 1]} : vector<64x16xf32> to vector<16x16xf32>
    %12 = tpu.concatenate %8, %9, %10, %11 in 1 : vector<16x16xf32>, vector<16x16xf32>, vector<16x16xf32>, vector<16x16xf32> -> vector<16x64xf32>
    %13 = arith.addf %12, %7 : vector<16x64xf32>
    %c0_10 = arith.constant 0 : index
    %c0_11 = arith.constant 0 : index
    %c0_12 = arith.constant 0 : index
    %14 = vector.load %arg6[%c0_10, %c0_11, %c0_12] : memref<1x16x64xf32, #tpu.memory_space<vmem>>, vector<1x16x64xf32>
    %15 = vector.shape_cast %14 : vector<1x16x64xf32> to vector<16x64xf32>
    %16 = vector.shape_cast %13 : vector<16x64xf32> to vector<1x16x64xf32>
    tpu.vector_store %arg6[%c0_10, %c0_11, %c0_12], %16 {strides = array<i32>} : memref<1x16x64xf32, #tpu.memory_space<vmem>>, vector<1x16x64xf32>,
    return
  }
  func.func @transform_0(%arg0: i32, %arg1: i32) -> (i32, i32, i32) {
    %c0_i32 = arith.constant 0 : i32
    %c0_i32_0 = arith.constant 0 : i32
    %c0_i32_1 = arith.constant 0 : i32
    return %arg1, %c0_i32, %c0_i32_0 : i32, i32, i32
  }
  func.func @transform_1(%arg0: i32, %arg1: i32) -> (i32, i32, i32) {
    %c0_i32 = arith.constant 0 : i32
    %c0_i32_0 = arith.constant 0 : i32
    %c0_i32_1 = arith.constant 0 : i32
    return %arg1, %c0_i32, %c0_i32_0 : i32, i32, i32
  }
  func.func @transform_2(%arg0: i32, %arg1: i32) -> (i32, i32) {
    %c0_i32 = arith.constant 0 : i32
    %c0_i32_0 = arith.constant 0 : i32
    return %arg0, %c0_i32 : i32, i32
  }
  func.func @transform_3(%arg0: i32, %arg1: i32) -> (i32, i32) {
    %c0_i32 = arith.constant 0 : i32
    %c0_i32_0 = arith.constant 0 : i32
    return %c0_i32, %arg0 : i32, i32
  }
  func.func @transform_4(%arg0: i32, %arg1: i32) -> (i32, i32, i32) {
    %c0_i32 = arith.constant 0 : i32
    %c0_i32_0 = arith.constant 0 : i32
    return %arg1, %c0_i32, %arg0 : i32, i32, i32
  }
}

</mosaic_0001>

<bundles_post_ra>
// kernel: spectral_conv2d_forward.1
= control target key start
LH: loop header
LB: loop body
LE: loop exit
PB: predicated region body
PF: predicated region fallthrough
CT: control target
= control target key end

     0   :  { %s1493_s0 = inlined_call_operand.hbm [shape: bf16[2,64,16], index: 0, kind: input, shape index: {}]   ;;  %s1494_s1 = inlined_call_operand.hbm [shape: bf16[2,16,64], index: 1, kind: input, shape index: {}]   ;;  %s1495_s2 = inlined_call_operand.hbm [shape: bf16[64,64], index: 2, kind: input, shape index: {}]   ;;  %s1496_s3 = inlined_call_operand.hbm [shape: bf16[64,64], index: 3, kind: input, shape index: {}]   ;;  %s1497_s4 = inlined_call_operand.hbm [shape: f32[2,16,64], index: 4, kind: output, shape index: {}]  }
   0x1   :  { %1504 = sst [smem:[#allocation17_spill]] %s1493_s0 }
   0x2   :  { %1505 = sst [smem:[#allocation18_spill]] %s1495_s2 }
   0x3   :  { %1506 = sst [smem:[#allocation19_spill]] %s1496_s3 }
   0x4   :  { %9 = vsyncpa [#allocation3], 0 }
   0x5   :  { %11 = vsyncpa [#allocation3 + $0x1], 0 }
   0x6   :  { %12 = vsyncpa [#allocation6], 0 }
   0x7   :  { %14 = vsyncpa [#allocation6 + $0x1], 0 }
   0x8   :  { %15 = vsyncpa [#allocation9], 0 }
   0x9   :  { %16 = vsyncpa [#allocation4], 0 }
   0xa   :  { %18 = vsyncpa [#allocation4 + $0x1], 0  ;;  %s1164_s15 = smov 0   ;;  %s1166_s16 = smov 0  }
   0xb   :  { %s1168_s17 = smov 0   ;;  %s1170_s18 = smov 0  }
   0xc   :  { %s1172_s19 = smov 0   ;;  %s1174_s20 = smov 0  }
   0xd LB: > { %s1195_s21 = sadd.s32 4294967295, %s1123_s20   ;;  %s719_s22 = sadd.s32 4294967294, %s1123_s20   ;;  %s1123_s20 = sphi %s1174_s20, %s24_s20   ;;  %s1119_s19 = sphi %s1172_s19, %s1533_s19   ;;  %s1115_s18 = sphi %s1170_s18, %s1532_s18   ;;  %s1111_s17 = sphi %s1168_s17, %s1531_s17   ;;  %s1107_s16 = sphi %s1166_s16, %s1530_s16   ;;  %s1103_s15 = sphi %s1164_s15, %s1529_s15  }
   0xe   : > { %p56_p0 = scmp.ne.s32.totalorder %s1107_s16, %s1103_s15  ;;  %p1498_p1 = scmp.eq.s32.totalorder %s1195_s21, 0 }
   0xf   : > { %p166_p3 = scmp.eq.s32.totalorder %s719_s22, 1  ;;  %p720_p5 = scmp.ge.s32.totalorder %s1123_s20, 1 }
  0x10   : > { %p1204_p4 = por %p1498_p1, %p56_p0  ;;  %p173_p7 = scmp.lt.s32.totalorder %s1123_s20, 3 }
  0x11   : > { %p1209_p6 = por %p166_p3, %p56_p0  ;;  %s1125_s26 = smov [#allocation7]  }
  0x12   : > { %s1507_s23 = scalar_select %p1204_p4, 1, 0 }
  0x13   : > { %s1508_s24 = scalar_select %p1209_p6, 1, 0 }
  0x14   : > { %p1214_p8 = pnand %p720_p5, %p173_p7  ;;  %s188_s27 = sshll.u32 %s1125_s26, 4  ;;  %s1218_s27 = int_to_ptr.vmem [resolvable:$true] %s188_s27 }
  0x15   : > { %s1126_s29 = smov [#allocation8]   ;;  %s1511_s2 = sld [smem:[#allocation18_spill]] }
  0x16   : > { %p817_p9 = pneg %p1214_p8  ;;  %s203_s30 = sshll.u32 %s1126_s29, 4  ;;  %s1229_s30 = int_to_ptr.vmem [resolvable:$true] %s203_s30 }
  0x18   : > { %p1225_p11 = pnand %p817_p9, %p1498_p1 }
  0x1a   : > { %p915_p13 = pneg %p1225_p11 }
  0x1b   : > { %s913_s7 = scalar_lea.hbm %s1511_s2, 512 }
  0x1c   : > { %p914_p12 = scmp.ne.s32.totalorder %s1511_s2, %s913_s7  ;;  %p920_p5 = scmp.lt.u32.totalorder %s913_s7, %s1511_s2 }
  0x1e   : > { %p916_p0 = pnand %p915_p13, %p914_p12 }
  0x20   : > { %p917_p3 = pneg %p916_p0 }
  0x22   : > { %p922_p7 = pnand %p920_p5, %p917_p3 }
  0x24   : > { %925 = shalt.err (!%p922_p7)
}
  0x25   : > { %s926_s12 = scalar_lea.vmem %s1218_s27, 512  ;;  %p934_p2 = scmp.lt.s32.totalorder %s1218_s27, %s1218_s27 }
  0x26   : > { %p927_p9 = scmp.ne.s32.totalorder %s1218_s27, %s926_s12  ;;  %p935_p12 = scmp.lt.s32.totalorder %s926_s12, %s926_s12 }
  0x28   : > { %p929_p10 = pnand %p927_p9, %p915_p13  ;;  %p936_p0 = por %p935_p12, %p934_p2 }
  0x2a   : > { %p930_p1 = pneg %p929_p10 }
  0x2c   : > { %p937_p6 = pnand %p936_p0, %p930_p1 }
  0x2e   : > { %940 = shalt.err (!%p937_p6)
}
  0x2f   : > { %s1499_s13 = smov 64   ;;  %s1128_s14 = smov 4  }
  0x30   : > { %820 = dma.hbm_to_vmem [thread:$0]  (!%p1225_p11), %s1511_s2, 512, %s1218_s27, [#allocation6], %s1499_s13, %s1499_s13, %s1128_s14  }
  0x31   : > { %s1512_s3 = sld [smem:[#allocation19_spill]] }
  0x37   : > { %s941_s6 = scalar_lea.hbm %s1512_s3, 512 }
  0x38   : > { %p942_p1 = scmp.ne.s32.totalorder %s1512_s3, %s941_s6  ;;  %p948_p10 = scmp.lt.u32.totalorder %s941_s6, %s1512_s3 }
  0x3a   : > { %p944_p2 = pnand %p942_p1, %p915_p13 }
  0x3c   : > { %p945_p6 = pneg %p944_p2 }
  0x3e   : > { %p950_p3 = pnand %p948_p10, %p945_p6 }
  0x40   : > { %953 = shalt.err (!%p950_p3)
}
  0x41   : > { %s954_s27 = scalar_lea.vmem %s1229_s30, 512  ;;  %p962_p12 = scmp.lt.s32.totalorder %s1229_s30, %s1229_s30 }
  0x42   : > { %p955_p5 = scmp.ne.s32.totalorder %s1229_s30, %s954_s27  ;;  %p963_p0 = scmp.lt.s32.totalorder %s954_s27, %s954_s27 }
  0x44   : > { %p957_p7 = pnand %p955_p5, %p915_p13  ;;  %p964_p1 = por %p963_p0, %p962_p12 }
  0x46   : > { %p958_p9 = pneg %p957_p7 }
  0x48   : > { %p965_p2 = pnand %p964_p1, %p958_p9 }
  0x4a   : > { %968 = shalt.err (!%p965_p2)
}
  0x4b   : > { %823 = dma.hbm_to_vmem [thread:$0]  (!%p1225_p11), %s1512_s3, 512, %s1229_s30, [#allocation9], %s1499_s13, %s1499_s13, %s1128_s14  }
  0x4c   : > { %s33_s28 = sadd.s32 1, %s1119_s19  ;;  %s43_s22 = sadd.s32 1, %s1111_s17 }
  0x4d   : > { %p34_p13 = scmp.ge.s32.totalorder %s33_s28, 2  ;;  %p50_p6 = scmp.ne.s32.totalorder %s1111_s17, %s1107_s16 }
  0x4e   : > { %p51_p10 = scmp.eq.s32.totalorder %s1123_s20, 0  ;;  %p837_p3 = scmp.lt.s32.totalorder %s1123_s20, 2 }
  0x4f   : > { %s1535_s28 = smov (%p34_p13, %s33_s28), 0  ;;  %p1514_p7 = scmp.eq.s32.totalorder %s1195_s21, 1 }
  0x50   : > { %1513 = sst [smem:[#allocation16_spill]] %s1535_s28  ;;  %p52_p5 = por %p51_p10, %p50_p6 }
  0x51   : > { %p1299_p9 = por %p1514_p7, %p50_p6  ;;  %s40_s29 = ssub.s32 %s1119_s19, %s1535_s28 }
  0x52   : > { %s1306_s5 = sand.u32 1, %s1111_s17   ;;  %p41_p11 = scmp.eq.s32.totalorder %s40_s29, 0 }
  0x53   : > { %s1515_s26 = scalar_select %p1299_p9, 1, 0 }
  0x54   : > { %s724_s30 = sshll.u32 %s1306_s5, 5  ;;  %s759_s6 = sshll.u32 %s1119_s19, 9 }
  0x55   : > { %s1311_s7 = scalar_select %p41_p11, %s1111_s17, %s43_s22  }
  0x56   : > { %s1516_s0 = sld [smem:[#allocation17_spill]]  ;;  %s221_s27 = scalar_lea.vmem [#allocation2], %s724_s30 }
  0x57   : > { %s228_s11 = sshll.u32 %s221_s27, 4  ;;  %p1320_p12 = pnand %p837_p3, %p52_p5  ;;  %s1324_s11 = int_to_ptr.vmem [resolvable:$true] %s228_s11 }
  0x58   : > { %s218_s29 = scalar_lea.sflag [#allocation3], %s1306_s5 }
  0x59   : > { %p971_p1 = pneg %p1320_p12 }
  0x5c   : > { %s1316_s10 = scalar_lea.hbm %s1516_s0, %s759_s6  ;;  %s974_s9 = scalar_lea.hbm %s1516_s0, 1024 }
  0x5d   : > { %s969_s8 = scalar_lea.hbm %s1316_s10, 512  ;;  %p975_p6 = scmp.lt.u32.totalorder %s1316_s10, %s1516_s0 }
  0x5e   : > { %p970_p0 = scmp.ne.s32.totalorder %s1316_s10, %s969_s8  ;;  %p976_p10 = scmp.lt.u32.totalorder %s974_s9, %s969_s8 }
  0x5f   : > { %p978_p5 = scmp.lt.u32.totalorder %s969_s8, %s1316_s10 }
  0x60   : > { %p972_p2 = pnand %p971_p1, %p970_p0  ;;  %p977_p3 = por %p976_p10, %p975_p6 }
  0x62   : > { %p973_p13 = pneg %p972_p2  ;;  %p979_p7 = por %p978_p5, %p977_p3 }
  0x64   : > { %p980_p11 = pnand %p979_p7, %p973_p13 }
  0x66   : > { %983 = shalt.err (!%p980_p11)
}
  0x67   : > { %s984_s22 = scalar_lea.vmem %s1324_s11, 512  ;;  %s1129_s30 = smov [#allocation2]  }
  0x68   : > { %p985_p0 = scmp.ne.s32.totalorder %s1324_s11, %s984_s22  ;;  %s989_s6 = sshll.u32 %s1129_s30, 4  ;;  %s990_s6 = int_to_ptr.vmem [resolvable:$false] %s989_s6 }
  0x69   : > { %s991_s13 = scalar_lea.vmem %s990_s6, 1024  ;;  %p992_p4 = scmp.lt.s32.totalorder %s1324_s11, %s990_s6 }
  0x6a   : > { %p987_p2 = pnand %p985_p0, %p971_p1  ;;  %p993_p6 = scmp.lt.s32.totalorder %s991_s13, %s984_s22 }
  0x6c   : > { %p988_p9 = pneg %p987_p2  ;;  %p994_p10 = por %p993_p6, %p992_p4 }
  0x6e   : > { %p995_p3 = pnand %p994_p10, %p988_p9 }
  0x70   : > { %998 = shalt.err (!%p995_p3)
}
  0x71   : > { %s1518_s8 = smov 64   ;;  %s727_s9 = sshll.u32 %s1306_s5, 3 }
  0x72   : > { %827 = dma.hbm_to_vmem [thread:$0]  (!%p1320_p12), %s1316_s10, 512, %s1324_s11, %s218_s29, %s1518_s8, %s1518_s8, %s1128_s14  }
  0x73   : > { %s760_s27 = sshll.u32 %s1119_s19, 7  ;;  %s242_s13 = scalar_lea.vmem [#allocation5], %s727_s9 }
  0x74   : > { %s1363_s6 = scalar_lea.hbm %s1494_s1, %s760_s27  ;;  %s249_s0 = sshll.u32 %s242_s13, 4  ;;  %s1365_s0 = int_to_ptr.vmem [resolvable:$true] %s249_s0 }
  0x75   : > { %s1519_s2 = sand.u32 1, %s1123_s20   ;;  %s999_s28 = scalar_lea.hbm %s1363_s6, 128 }
  0x76   : > { %s1369_s3 = scalar_lea.sflag [#allocation6], %s1519_s2  ;;  %p1000_p4 = scmp.ne.s32.totalorder %s1363_s6, %s999_s28 }
  0x77   : > { %s1004_s11 = scalar_lea.hbm %s1494_s1, 256  ;;  %p1005_p5 = scmp.lt.u32.totalorder %s1363_s6, %s1494_s1 }
  0x78   : > { %p1002_p9 = pnand %p1000_p4, %p971_p1  ;;  %p1006_p7 = scmp.lt.u32.totalorder %s1004_s11, %s999_s28 }
  0x79   : > { %p1008_p0 = scmp.lt.u32.totalorder %s999_s28, %s1363_s6 }
  0x7a   : > { %p1003_p13 = pneg %p1002_p9  ;;  %p1007_p11 = por %p1006_p7, %p1005_p5 }
  0x7c   : > { %p1009_p2 = por %p1008_p0, %p1007_p11 }
  0x7e   : > { %p1010_p6 = pnand %p1009_p2, %p1003_p13 }
  0x80   : > { %1013 = shalt.err (!%p1010_p6)
}
  0x81   : > { %s1014_s2 = scalar_lea.vmem %s1365_s0, 128  ;;  %s1130_s9 = smov [#allocation5]  }
  0x82   : > { %p1015_p10 = scmp.ne.s32.totalorder %s1365_s0, %s1014_s2  ;;  %s1019_s22 = sshll.u32 %s1130_s9, 4  ;;  %s1020_s22 = int_to_ptr.vmem [resolvable:$false] %s1019_s22 }
  0x83   : > { %s1021_s30 = scalar_lea.vmem %s1020_s22, 256  ;;  %p1022_p9 = scmp.lt.s32.totalorder %s1365_s0, %s1020_s22 }
  0x84   : > { %p1017_p3 = pnand %p1015_p10, %p971_p1  ;;  %p1023_p5 = scmp.lt.s32.totalorder %s1021_s30, %s1014_s2 }
  0x86   : > { %p1018_p4 = pneg %p1017_p3  ;;  %p1024_p7 = por %p1023_p5, %p1022_p9 }
  0x88   : > { %p1025_p11 = pnand %p1024_p7, %p1018_p4 }
  0x8a   : > { %1028 = shalt.err (!%p1025_p11)
}
  0x8b   : > { %830 = dma.hbm_to_vmem [thread:$0]  (!%p1320_p12), %s1363_s6, 128, %s1365_s0, %s1369_s3, %s1518_s8, %s1518_s8, %s1128_s14  }
  0x8c   : > { %261 = sbr.rel (%p1214_p8) target bundleno = 537 (0x219), region = 36  ;;  %s1401_s28 = sand.u32 (!%p1214_p8), 1, %s1107_s16  }
  0x8d   : > { %s731_s13 = sshll.u32 (!%p1214_p8), %s1401_s28, 5  ;;  %s264_s5 = scalar_lea.sflag (!%p1214_p8), [#allocation3], %s1401_s28 }
  0x8e   : > { %s267_s10 = scalar_lea.vmem (!%p1214_p8), [#allocation2], %s731_s13  ;;  %p1520_p1 = scmp.ne.s32.totalorder (!%p1214_p8), %s1507_s23, 0 }
  0x93   : > { %1082 = dma.done.wait (%p1520_p1), %s264_s5, 512  }
  0x94   : > { %1084 = vsyncadd (%p1520_p1), %s264_s5, 4294966784  ;;  %s272_s0 = sand.u32 1, %s1195_s21   ;;  %s732_s3 = sshll.u32 %s1401_s28, 3 }
  0x95   : > { %s273_s25 = scalar_lea.sflag [#allocation6], %s272_s0  ;;  %s1411_s14 = scalar_lea.vmem [#allocation5], %s732_s3 }
  0x96   : > { %1086 = dma.done.wait (%p1520_p1), %s273_s25, 128  }
  0x97   : > { %1088 = vsyncadd (%p1520_p1), %s273_s25, 4294967168  ;;  %p1521_p8 = scmp.eq.s32.totalorder %s1195_s21, 0 }
  0x99   : > { %1090 = dma.done.wait (%p1521_p8), [#allocation6], 512   ;;  %p1522_p12 = pmov %p1521_p8 }
  0x9a   : > { %p1523_p13 = pmov %p1521_p8 }
  0x9b   : > { %1092 = vsyncadd (%p1522_p12), [#allocation6], 4294966784 }
  0x9c   : > { %1094 = dma.done.wait (%p1523_p13), [#allocation9], 512   ;;  %p1524_p0 = pmov %p1521_p8 }
  0x9d   : > { %v1131_v0 = vmov 0.0   ;;  %vm1132_vm0 = vmmov 0   ;;  %v900_v1 = vld [vmem:[%s267_s10] sm:$0xff]   ;;  %v901_v2 = vld [vmem:[%s267_s10 + $0x8] sm:$0xff]   ;;  %v902_v3 = vld [vmem:[%s267_s10 + $0x10] sm:$0xff]   ;;  %vm376_vm1 = vcmask 523264  }
  0x9e   : > { %1096 = vsyncadd (%p1524_p0), [#allocation9], 4294966784  ;;  %791 = vmatprep.subr.bf16.mxu1 %v1131_v0  ;;  %799 = vmatprep.mubr.msk.bf16.mxu1 %vm1132_vm0, %v1131_v0  ;;  %v904_v4 = vld [vmem:[#allocation7] sm:$0xff]   ;;  %v903_v5 = vld [vmem:[%s267_s10 + $0x18] sm:$0xff]   ;;  %s1133_s21 = smov 16   ;;  %s1134_s23 = smov 48  }
  0x9f   : > { %775 = vmatprep.subr.bf16.mxu0 %v900_v1  ;;  %783 = vmatprep.mubr.msk.bf16.mxu0 %vm376_vm1, %v904_v4  ;;  %v908_v6 = vld [vmem:[#allocation8] sm:$0xff]   ;;  %v909_v7 = vld [vmem:[#allocation8 + $0x8] sm:$0xff]   ;;  %v910_v9 = vld [vmem:[#allocation8 + $0x10] sm:$0xff]   ;;  %s1135_s12 = smov 32   ;;  %vm561_vm2 = vcmask 130048   ;;  %vm564_vm3 = vcmask 261120  }
  0xa0   : > { %776 = vmatpush3.bf16.msra.mxu0 %v900_v1  ;;  %792 = vmatpush3.bf16.msra.mxu1 %v908_v6  ;;  %v905_v8 = vld [vmem:[#allocation7 + $0x8] sm:$0xff]   ;;  %v906_v10 = vld [vmem:[#allocation7 + $0x10] sm:$0xff]   ;;  %v911_v11 = vld [vmem:[#allocation8 + $0x18] sm:$0xff]   ;;  %s735_s8 = sshll.u32 %s1401_s28, 4  ;;  %vm567_vm4 = vcmask 392192   ;;  %s761_s29 = sshll.u32 %s1115_s18, 8 }
  0xa1   : > { %777 = vmatprep.subr.bf16.mxu0 %v901_v2  ;;  %793 = vmatprep.subr.bf16.mxu1 %v1131_v0  ;;  %v912_v12 = vld [vmem:[%s1411_s14] sm:$0xff]   ;;  %s313_s6 = scalar_lea.vmem [#allocation10], %s735_s8  ;;  %s1443_s9 = scalar_lea.hbm %s1497_s4, %s761_s29 }
  0xa2   : > { %v907_v13 = vld [vmem:[#allocation7 + $0x18] sm:$0xff]   ;;  %s589_s11 = sshll.u32 %s313_s6, 4  ;;  %s575_s18 = scalar_lea.sflag [#allocation4], %s1401_s28  ;;  %s1436_s11 = int_to_ptr.vmem [resolvable:$true] %s589_s11 }
  0xa3   : > { %s1029_s22 = scalar_lea.vmem %s1436_s11, 256  ;;  %p1525_p6 = scmp.ne.s32.totalorder %s1515_s26, 0 }
  0xa4   : > { %778 = vmatpush3.bf16.msra.mxu0 %v901_v2  ;;  %794 = vmatpush3.bf16.msra.mxu1 %v909_v7  ;;  %p1030_p2 = scmp.ne.s32.totalorder %s1436_s11, %s1029_s22  ;;  %s1136_s30 = smov [#allocation10]  }
  0xa5   : > { %779 = vmatprep.subr.bf16.mxu0 %v902_v3  ;;  %795 = vmatprep.subr.bf16.mxu1 %v1131_v0  ;;  %s1033_s13 = sshll.u32 %s1136_s30, 4  ;;  %s1034_s13 = int_to_ptr.vmem [resolvable:$false] %s1033_s13 }
  0xa6   : > { %p1031_p10 = pnand %p1030_p2, %p1525_p6  ;;  %s1035_s5 = scalar_lea.vmem %s1034_s13, 512 }
  0xa7   : > { %p1036_p4 = scmp.lt.s32.totalorder %s1436_s11, %s1034_s13  ;;  %p1037_p9 = scmp.lt.s32.totalorder %s1035_s5, %s1029_s22 }
  0xa8   : > { %780 = vmatpush3.bf16.msra.mxu0 %v902_v3  ;;  %796 = vmatpush3.bf16.msra.mxu1 %v910_v9  ;;  %p1032_p3 = pneg %p1031_p10 }
  0xa9   : > { %781 = vmatprep.subr.bf16.mxu0 %v903_v5  ;;  %797 = vmatprep.subr.bf16.mxu1 %v1131_v0  ;;  %p1038_p5 = por %p1037_p9, %p1036_p4 }
  0xab   : > { %p1039_p7 = pnand %p1038_p5, %p1032_p3 }
  0xac   : > { %782 = vmatpush3.bf16.msra.mxu0 %v903_v5  ;;  %798 = vmatpush3.bf16.msra.mxu1 %v911_v11 }
  0xaf   : > { %784 = vmatmul.mubr.msk.bf16.vlgmr.msra.gmra.mrb[0].mxu0 %vm376_vm1, %v905_v8  ;;  %800 = vmatmul.mubr.msk.bf16.vlgmr.msra.gmra.mrb[0].mxu1 %vm376_vm1, %v912_v12 }
  0xb0   : > { %787 = vmatprep.mubr.msk.bf16.mxu0 %vm376_vm1, %v906_v10 }
  0xb7   : > { %788 = vmatmul.mubr.msk.bf16.gmra.mrb[4].mxu0 %vm376_vm1, %v907_v13 }
 0x182   : > { %v785_v14 = vpop.f32.mrb[0].mxu0  ;;  %v530_v18 = vpop.f32.mrb[0].mxu1 }
 0x183   : > { %539 = vrot.lane.b32.xlu0 %v785_v14, %s1133_s21  ;;  %v423_v15 = vpop.f32.mrb[1].mxu0  ;;  %v801_v20 = vpop.f32.mrb[1].mxu1 }
 0x184   : > { %v786_v16 = vpop.f32.mrb[2].mxu0  ;;  %v533_v22 = vpop.f32.mrb[2].mxu1 }
 0x185   : > { %v426_v17 = vpop.f32.mrb[3].mxu0  ;;  %v802_v24 = vpop.f32.mrb[3].mxu1 }
 0x187   : > { %541 = vrot.lane.b32.xlu0 %v786_v16, %s1133_s21 }
 0x18a   : > { %v789_v19 = vpop.f32.mrb[4].mxu0 }
 0x18b   : > { %555 = vrot.lane.b32.xlu0 %v789_v19, %s1134_s23  ;;  %v439_v21 = vpop.f32.mrb[5].mxu0 }
 0x18c   : > { %547 = vrot.lane.b32.xlu1 %v439_v21, %s1135_s12  ;;  %v790_v23 = vpop.f32.mrb[6].mxu0 }
 0x18d   : > { %v442_v25 = vpop.f32.mrb[7].mxu0 }
 0x190   : > { %549 = vrot.lane.b32.xlu1 %v442_v25, %s1135_s12 }
 0x194   : > { %557 = vrot.lane.b32.xlu1 %v790_v23, %s1134_s23 }
 0x1f5   : > { %v540_v26 = vpop.permute.xlu0 %539 }
 0x1f6   : > { %v562_v28 = vsel %vm561_vm2, %v423_v15, %v540_v26 }
 0x1f9   : > { %v542_v27 = vpop.permute.xlu0 %541 }
 0x1fa   : > { %v563_v35 = vsel %vm561_vm2, %v426_v17, %v542_v27 }
 0x1fd   : > { %v556_v30 = vpop.permute.xlu0 %555 }
 0x1fe   : > { %v548_v29 = vpop.permute.xlu1 %547 }
 0x1ff   : > { %v565_v31 = vsel %vm564_vm3, %v562_v28, %v548_v29 }
 0x200   : > { %v568_v32 = vsel %vm567_vm4, %v565_v31, %v556_v30 }
 0x201   : > { %v570_v33 = vadd.f32 %v568_v32, %v530_v18 }
 0x202   : > { %v550_v34 = vpop.permute.xlu1 %549 }
 0x203   : > { %572 = vst.msk [vmem:[%s313_s6] sm:$0xff] %vm376_vm1, %v570_v33  ;;  %v566_v36 = vsel %vm564_vm3, %v563_v35, %v550_v34 }
 0x206   : > { %v558_v37 = vpop.permute.xlu1 %557 }
 0x207   : > { %v569_v38 = vsel %vm567_vm4, %v566_v36, %v558_v37 }
 0x208   : > { %v571_v39 = vadd.f32 %v569_v38, %v533_v22 }
 0x20a   : > { %573 = vst.msk [vmem:[%s313_s6 + $0x8] sm:$0xff] %vm376_vm1, %v571_v39 }
 0x20b   : > { %1042 = shalt.err (!%p1039_p7)
}
 0x20c   : > { %s1043_s10 = scalar_lea.hbm %s1443_s9, 256  ;;  %s1047_s25 = scalar_lea.hbm %s1497_s4, 512 }
 0x20d   : > { %p1044_p11 = scmp.ne.s32.totalorder %s1443_s9, %s1043_s10  ;;  %p1048_p12 = scmp.lt.u32.totalorder %s1443_s9, %s1497_s4 }
 0x20e   : > { %p1049_p13 = scmp.lt.u32.totalorder %s1047_s25, %s1043_s10  ;;  %p1051_p2 = scmp.lt.u32.totalorder %s1043_s10, %s1443_s9 }
 0x20f   : > { %p1045_p1 = pnand %p1044_p11, %p1525_p6 }
 0x210   : > { %p1050_p0 = por %p1049_p13, %p1048_p12 }
 0x211   : > { %p1046_p8 = pneg %p1045_p1 }
 0x212   : > { %p1052_p10 = por %p1051_p2, %p1050_p0 }
 0x214   : > { %p1053_p3 = pnand %p1052_p10, %p1046_p8 }
 0x216   : > { %1056 = shalt.err (!%p1053_p3)
}
 0x217   : > { %s1137_s23 = smov 128   ;;  %s1138_s12 = smov 8  }
 0x218   : > { %815 = dma.vmem_to_hbm [thread:$0]  (%p1525_p6), %s1436_s11, 256, %s1443_s9, %s575_s18, %s1137_s23, %s1137_s23, %s1138_s12  }
 0x219 PF: > { %s604_s8 = sand.u32 1, %s1103_s15   ;;  %p1526_p4 = scmp.ne.s32.totalorder %s1508_s24, 0 }
 0x21a   : > { %p1527_p9 = scmp.ge.s32.totalorder %s1123_s20, 2  ;;  %s605_s6 = scalar_lea.sflag [#allocation4], %s604_s8 }
 0x21c   : > { %p832_p5 = pnand %p1527_p9, %p1526_p4 }
 0x21e   : > { %1098 = dma.done.wait (!%p832_p5), %s605_s6, 256  }
 0x21f   : > { %1100 = vsyncadd (!%p832_p5), %s605_s6, 4294967040  ;;  %s24_s20 = sadd.s32 1, %s1123_s20   ;;  %s1528_s26 = sld [smem:[#allocation16_spill]] }
 0x220   : > { %p21_p7 = scmp.ge.s32.totalorder %s24_s20, 4   ;;  %s1529_s15 = smov %s1107_s16 }
 0x221   : > { %s1530_s16 = smov %s1111_s17  ;;  %s1531_s17 = smov %s1311_s7 }
 0x222   : > { %s1532_s18 = smov %s1119_s19  ;;  %23 = sbr.rel (!%p21_p7) target bundleno = 13 (0xd), region = 104 }
 0x225   : > { %s1533_s19 = smov %s1528_s26 }
 0x229   :  { %610 = vsyncpa [#allocation3], 1 }
 0x22a   :  { %612 = vsyncpa [#allocation3 + $0x1], 1 }
 0x22b   :  { %613 = vsyncpa [#allocation6], 1 }
 0x22c   :  { %615 = vsyncpa [#allocation6 + $0x1], 1 }
 0x22d   :  { %616 = vsyncpa [#allocation9], 1 }
 0x22e   :  { %617 = vsyncpa [#allocation4], 1 }
 0x22f   :  { %619 = vsyncpa [#allocation4 + $0x1], 1 }

</bundles_post_ra>
